<compile_context>
chip_gen: v7x
topology: tpu7x:2x2x1
jax: 0.10.0
libtpu: 0.0.40
codegen_flags: <defaults>
</compile_context>

<pallas_src>
import numpy as np
import jax
import jax.numpy as jnp
from jax.experimental import pallas as pl
from jax.experimental.pallas import tpu as pltpu


def get_sinusoid_encoding_table(max_position: int, embedding_size: int) -> jnp.ndarray:
    """Same math as the PyTorch staticmethod (angles built in f64, cast to f32, then sin/cos)."""
    pos = np.arange(max_position, dtype=np.float64)[:, None]          # (P, 1)
    j = np.arange(embedding_size, dtype=np.int64)[None, :]            # (1, D)
    angle = (pos / np.power(10000.0, 2 * (j // 2) / embedding_size)).astype(np.float32)
    table = np.where(j % 2 == 0, np.sin(angle), np.cos(angle)).astype(np.float32)
    return jnp.asarray(table)                                          # (P, D) f32


def _sincos_pe_kernel(ids_ref, consts_ref, out_ref):
    # ids_ref:    (TN, 1) int32 -- tile of flattened position ids (rows on sublanes)
    # consts_ref: (2, D)  f32   -- row 0: inv_freq, row 1: phase (0 / pi/2)
    # out_ref:    (TN, D)       -- D on the lane axis
    ids_f = ids_ref[...].astype(jnp.float32)                           # (TN, 1), exact for p < 2^24
    inv_freq = consts_ref[0:1, :]                                       # (1, D)
    phase = consts_ref[1:2, :]                                          # (1, D)
    # One VPU multiply-add + one EUP transcendental per element; no select, no iota.
    out_ref[...] = jnp.sin(ids_f * inv_freq + phase).astype(out_ref.dtype)


def _round_up(x: int, m: int) -> int:
    return ((x + m - 1) // m) * m


def _choose_tile_rows(n: int, d: int) -> int:
    """D-aware row tile: ~2 MiB output block, multiple of 8, VMEM-safe, >=2 grid steps."""
    target_block_bytes = 2 * 1024 * 1024        # ~1-4 MiB sweet spot per tiling sweep
    max_block_bytes = 12 * 1024 * 1024          # double-buffered => 24 MiB (v7x-safe)
    bytes_per_row = d * 4

    rows = target_block_bytes // bytes_per_row
    rows = max(256, min(4096, rows))
    rows = min(rows, max(8, (max_block_bytes // bytes_per_row) // 8 * 8))
    rows = _round_up(max(rows, 8), 8)

    n_pad8 = _round_up(max(n, 1), 8)
    rows = min(rows, n_pad8)
    # Keep at least 2 grid steps when the problem allows it, so megacore (v7x's two
    # TensorCores) can shard the "parallel" row axis instead of idling one core.
    if rows >= n_pad8 and n_pad8 >= 16:
        rows = _round_up((n_pad8 + 1) // 2, 8)
    return max(8, rows)


def sinusoidal_positional_embedding(position_ids: jnp.ndarray,
                                    embedding_size: int,
                                    out_dtype=jnp.float32) -> jnp.ndarray:
    """position_ids: (B, S) int -> (B, S, embedding_size) out_dtype, frozen sin/cos PE lookup."""
    B, S = position_ids.shape
    D = int(embedding_size)
    n = B * S

    tile = _choose_tile_rows(n, D)
    n_pad = _round_up(n, tile)

    ids_flat = position_ids.reshape(n, 1).astype(jnp.int32)
    if n_pad != n:
        ids_flat = jnp.pad(ids_flat, ((0, n_pad - n), (0, 0)))          # pad rows -> id 0 (sliced off)

    # Constants built in f64 on host (matches the table construction), cast to f32.
    j = np.arange(D, dtype=np.int64)
    inv_freq = np.power(10000.0, -(2.0 * (j // 2)) / D)
    phase = (j % 2).astype(np.float64) * (np.pi / 2.0)                  # sin(x + pi/2) == cos(x)
    consts = jnp.asarray(np.stack([inv_freq, phase]).astype(np.float32))  # (2, D)

    # Explicit VMEM budget: double-buffered output + ids blocks, resident consts, headroom.
    out_elem_bytes = jnp.dtype(out_dtype).itemsize
    working_set = 2 * tile * D * out_elem_bytes + 2 * tile * 4 + 2 * D * 4
    vmem_limit_bytes = int(min(32 * 1024 * 1024,
                               max(16 * 1024 * 1024, working_set + 2 * 1024 * 1024)))

    # TODO(synk): for toy D < 128 the output stores are masked (vst.msk); packing k=128//D
    # rows per lane-dense output row is not done here (irrelevant for real hidden sizes).
    out = pl.pallas_call(
        _sincos_pe_kernel,
        out_shape=jax.ShapeDtypeStruct((n_pad, D), out_dtype),
        grid_spec=pltpu.PrefetchScalarGridSpec(
            num_scalar_prefetch=0,
            grid=(n_pad // tile,),
            in_specs=[
                pl.BlockSpec((tile, 1), lambda i: (i, 0)),    # ids tile
                pl.BlockSpec((2, D), lambda i: (0, 0)),       # inv_freq + phase, constant block
            ],
            out_specs=pl.BlockSpec((tile, D), lambda i: (i, 0)),
        ),
        compiler_params=pltpu.CompilerParams(
            dimension_semantics=("parallel",),
            vmem_limit_bytes=vmem_limit_bytes,
        ),
    )(ids_flat, consts)

    return out[:n].reshape(B, S, D)


if __name__ == "__main__":
    MAX_POSITION = 64
    EMBEDDING_SIZE = 32
    B, S = 2, 8

    key = jax.random.PRNGKey(0)
    position_ids = jax.random.randint(key, (B, S), 0, MAX_POSITION, dtype=jnp.int32)

    out = sinusoidal_positional_embedding(position_ids, EMBEDDING_SIZE)
    out = jax.block_until_ready(out)

    # Reference: the frozen table lookup (== nn.Embedding.from_pretrained forward).
    table = get_sinusoid_encoding_table(MAX_POSITION, EMBEDDING_SIZE)
    ref = jnp.take(table, position_ids, axis=0)
    np.testing.assert_allclose(np.asarray(out), np.asarray(ref), rtol=1e-4, atol=1e-4)
    assert out.shape == (B, S, EMBEDDING_SIZE) and out.dtype == jnp.float32

    print("KERNEL_OK")
</pallas_src>

<mosaic_0001>
module attributes {stable_mosaic.version = 11 : i64} {
  func.func @_sincos_pe_kernel(%arg0: i32, %arg1: memref<8x1xi32, #tpu.memory_space<vmem>>, %arg2: memref<2x32xf32, #tpu.memory_space<vmem>>, %arg3: memref<8x32xf32, #tpu.memory_space<vmem>>) attributes {dimension_semantics = [#tpu.dimension_semantics<parallel>], iteration_bounds = array<i64: 2>, scalar_prefetch = 0 : i64, scratch_operands = 0 : i64, tpu.core_type = #tpu.core_type<tc>, window_params = [{transform_indices = @transform_0, window_bounds = array<i64: 8, 1>}, {pipeline_mode = #tpu.pipeline_mode<synchronous>, transform_indices = @transform_1, window_bounds = array<i64: 2, 32>}, {transform_indices = @transform_2, window_bounds = array<i64: 8, 32>}]} {
    %c0 = arith.constant 0 : index
    %c0_0 = arith.constant 0 : index
    %0 = vector.load %arg1[%c0, %c0_0] : memref<8x1xi32, #tpu.memory_space<vmem>>, vector<8x1xi32>
    %1 = arith.sitofp %0 : vector<8x1xi32> to vector<8x1xf32>
    %c0_1 = arith.constant 0 : index
    %c0_2 = arith.constant 0 : index
    %2 = vector.load %arg2[%c0_1, %c0_2] : memref<2x32xf32, #tpu.memory_space<vmem>>, vector<1x32xf32>
    %c1 = arith.constant 1 : index
    %c0_3 = arith.constant 0 : index
    %3 = vector.load %arg2[%c1, %c0_3] : memref<2x32xf32, #tpu.memory_space<vmem>>, vector<1x32xf32>
    %4 = vector.broadcast %1 : vector<8x1xf32> to vector<8x32xf32>
    %5 = vector.broadcast %2 : vector<1x32xf32> to vector<8x32xf32>
    %6 = arith.mulf %4, %5 : vector<8x32xf32>
    %7 = vector.broadcast %3 : vector<1x32xf32> to vector<8x32xf32>
    %8 = arith.addf %6, %7 : vector<8x32xf32>
    %9 = math.sin %8 : vector<8x32xf32>
    %c0_4 = arith.constant 0 : index
    %c0_5 = arith.constant 0 : index
    %10 = vector.load %arg3[%c0_4, %c0_5] : memref<8x32xf32, #tpu.memory_space<vmem>>, vector<8x32xf32>
    tpu.vector_store %arg3[%c0_4, %c0_5], %9 {strides = array<i32>} : memref<8x32xf32, #tpu.memory_space<vmem>>, vector<8x32xf32>,
    return
  }
  func.func @transform_0(%arg0: i32) -> (i32, i32) {
    %c0_i32 = arith.constant 0 : i32
    %c0_i32_0 = arith.constant 0 : i32
    return %arg0, %c0_i32 : i32, i32
  }
  func.func @transform_1(%arg0: i32) -> (i32, i32) {
    %c0_i32 = arith.constant 0 : i32
    %c0_i32_0 = arith.constant 0 : i32
    %c0_i32_1 = arith.constant 0 : i32
    return %c0_i32, %c0_i32_0 : i32, i32
  }
  func.func @transform_2(%arg0: i32) -> (i32, i32) {
    %c0_i32 = arith.constant 0 : i32
    %c0_i32_0 = arith.constant 0 : i32
    return %arg0, %c0_i32 : i32, i32
  }
}

</mosaic_0001>

<bundles_post_ra>
// kernel: tpu_custom_call.1
= control target key start
LH: loop header
LB: loop body
LE: loop exit
PB: predicated region body
PF: predicated region fallthrough
CT: control target
= control target key end

     0   :  { %7 = vsyncpa [#allocation3], 0  ;;  %s622_s0 = inlined_call_operand.vmem [shape: s32[16,1], index: 0, kind: input, shape index: {}]   ;;  %s623_s1 = inlined_call_operand.vmem [shape: f32[2,32], index: 1, kind: input, shape index: {}]   ;;  %s624_s2 = inlined_call_operand.hbm [shape: f32[16,32], index: 2, kind: output, shape index: {}]  }
   0x1   :  { %9 = vsyncpa [#allocation3 + $0x1], 0  ;;  %s495_s9 = smov 0   ;;  %s497_s10 = smov 0  }
   0x2   :  { %s499_s11 = smov 0   ;;  %s501_s12 = smov 0  }
   0x3 LB: > { %s516_s13 = sadd.s32 4294967295, %s470_s12   ;;  %s337_s14 = sadd.s32 4294967294, %s470_s12   ;;  %s470_s12 = sphi %s501_s12, %s630_s12   ;;  %s466_s11 = sphi %s499_s11, %s629_s11   ;;  %s462_s10 = sphi %s497_s10, %s628_s10   ;;  %s458_s9 = sphi %s495_s9, %s627_s9  }
   0x4   : > { %s520_s15 = sadd.s32 1, %s470_s12   ;;  %s69_s16 = sadd.s32 1, %s466_s11 }
   0x5   : > { %s66_s17 = ssub.s32 %s470_s12, %s520_s15  ;;  %p79_p0 = scmp.ne.s32.totalorder %s466_s11, %s462_s10 }
   0x6   : > { %p67_p1 = scmp.eq.s32.totalorder %s66_s17, 0  ;;  %p80_p2 = scmp.eq.s32.totalorder %s516_s13, 1 }
   0x7   : > { %p85_p3 = scmp.ne.s32.totalorder %s462_s10, %s458_s9  ;;  %p86_p4 = scmp.eq.s32.totalorder %s337_s14, 1 }
   0x8   : > { %s531_s18 = scalar_select %p67_p1, %s466_s11, %s69_s16  }
   0x9   : > { %p533_p5 = por %p80_p2, %p79_p0  ;;  %p537_p6 = por %p86_p4, %p85_p3 }
   0xa   : > { %p340_p7 = scmp.ge.s32.totalorder %s470_s12, 1  ;;  %p114_p8 = scmp.lt.s32.totalorder %s470_s12, 3 }
   0xc   : > { %p115_p9 = pnand %p340_p7, %p114_p8 }
   0xd   : > { %p135_p10 = scmp.lt.s32.totalorder (!%p115_p9), %s516_s13, 1  ;;  %v472_v0 = vmov (!%p115_p9), 0   ;;  %v343_v3 = vld [vmem:[%s623_s1] ss:$0 sm:$0xff] (!%p115_p9)  ;;  %v344_v4 = vld [vmem:[%s623_s1 + $0x1] ss:$0 sm:$0xff] (!%p115_p9) }
   0xe   : > { %118 = sbr.rel (%p115_p9) target bundleno = 253 (0xfd), region = 28  ;;  %403 = vset.pattern.permute.xlu0 (!%p115_p9), %v472_v0  ;;  %v473_v18 = vmov (!%p115_p9), 683565275   ;;  %v474_v20 = vmov (!%p115_p9), 2475754826   ;;  %s132_s30 = sand.u32 (!%p115_p9), 1, %s462_s10  }
   0xf   : > { %v475_v23 = vmov (!%p115_p9), 2131351028   ;;  %v476_v26 = vmov (!%p115_p9), 2102212464   ;;  %v477_v29 = vmov (!%p115_p9), 920167782  }
  0x10   : > { %v478_v32 = vmov (!%p115_p9), 1326507024   ;;  %s341_s3 = sshll.u32 (!%p115_p9), %s132_s30, 3  ;;  %s350_s4 = sshll.u32 (!%p115_p9), %s516_s13, 7  ;;  %vm262_vm12 = vcmask (!%p115_p9), 261120  }
  0x11   : > { %s134_s5 = scalar_lea.vmem (!%p115_p9), [#allocation2], %s341_s3  ;;  %s580_s14 = scalar_lea.hbm (!%p115_p9), %s624_s2, %s350_s4 }
  0x12   : > { %s278_s6 = sshll.u32 (!%p115_p9), %s134_s5, 4  ;;  %s479_s17 = smov (!%p115_p9), [#allocation2]   ;;  %s582_s6 = int_to_ptr.vmem [resolvable:$true] %s278_s6 }
  0x13   : > { %s408_s16 = scalar_lea.vmem (!%p115_p9), %s582_s6, 128 }
  0x14   : > { %p409_p11 = scmp.ne.s32.totalorder (!%p115_p9), %s582_s6, %s408_s16 }
  0x15   : > { %s136_s21 = scalar_select %p135_p10, %s516_s13, 1 }
  0x16   : > { %s265_s13 = scalar_lea.sflag [#allocation3], %s132_s30  ;;  %p410_p12 = pnand %p409_p11, %p533_p5 }
  0x17   : > { %s342_s22 = sshll.u32 %s136_s21, 3  ;;  %s412_s21 = sshll.u32 %s479_s17, 4  ;;  %s413_s21 = int_to_ptr.vmem [resolvable:$false] %s412_s21 }
  0x18   : > { %s138_s25 = scalar_lea.vmem %s622_s0, %s342_s22  ;;  %p411_p13 = pneg %p410_p12 }
  0x19   : > { %v139_v1 = vld [vmem:[%s138_s25] sm:$0xff]  ;;  %s414_s22 = scalar_lea.vmem %s413_s21, 256  ;;  %p415_p0 = scmp.lt.s32.totalorder %s582_s6, %s413_s21 }
  0x1a   : > { %v140_v2 = vcvt.s32.f32 %v139_v1  ;;  %p416_p1 = scmp.lt.s32.totalorder %s414_s22, %s408_s16 }
  0x1c   : > { %145 = vperm.xlu0 %403, %v140_v2   ;;  %p417_p2 = por %p416_p1, %p415_p0 }
  0x1e   : > { %p418_p3 = pnand %p417_p2, %p411_p13 }
  0x9b   : > { %v146_v5 = vpop.permute.xlu0 %145 }
  0x9c   : > { %v152_v6 = vmul.f32 %v343_v3, %v146_v5 }
  0x9e   : > { %v554_v7 = vadd.f32 %v344_v4, %v152_v6 }
  0xa0   : > { %v161_v8 = vand.u32 2139095040, %v554_v7  ;;  %v158_v12 = vand.u32 2147483647, %v554_v7  ;;  %vm160_vm7 = vcmp.lt.s32.totalorder %v554_v7, 0  ;;  %vm250_vm13 = vweird.f32 %v554_v7 }
  0xa2   : > { %v162_v9 = vshrl.u32 %v161_v8, 23  ;;  %v165_v15 = vand.u32 8388607, %v158_v12  ;;  %vm159_vm8 = vcmp.le.f32.partialorder %v158_v12, 0.7853982 }
  0xa4   : > { %v345_v10 = vadd.s32 4294967169, %v162_v9  ;;  %v166_v34 = vor.u32 8388608, %v165_v15 }
  0xa6   : > { %v168_v11 = vadd.s32 1, %v345_v10  ;;  %v206_v48 = vshll.u32 %v166_v34, 8 }
  0xa8   : > { %vm169_vm0 = vcmp.gt.s32.totalorder %v168_v11, 0 }
  0xa9   : > { %v170_v13 = vsel %vm169_vm0, %v168_v11, 0 }
  0xaa   : > { %v172_v14 = vand.u32 31, %v170_v13  ;;  %v171_v17 = vshrl.u32 %v170_v13, 5 }
  0xac   : > { %v173_v16 = vsub.s32 32, %v172_v14  ;;  %v175_v19 = vshll.u32 %v473_v18, %v172_v14  ;;  %v178_v21 = vshll.u32 %v474_v20, %v172_v14  ;;  %v181_v25 = vshll.u32 %v475_v23, %v172_v14 }
  0xad   : > { %v184_v28 = vshll.u32 %v476_v26, %v172_v14  ;;  %v187_v31 = vshll.u32 %v477_v29, %v172_v14  ;;  %vm190_vm1 = vcmp.lt.s32.totalorder %v171_v17, 1  ;;  %vm193_vm2 = vcmp.lt.s32.totalorder %v171_v17, 4 }
  0xae   : > { %v176_v22 = vshrl.u32 %v474_v20, %v173_v16  ;;  %v179_v24 = vshrl.u32 %v475_v23, %v173_v16  ;;  %v182_v27 = vshrl.u32 %v476_v26, %v173_v16  ;;  %v185_v30 = vshrl.u32 %v477_v29, %v173_v16 }
  0xaf   : > { %v188_v33 = vshrl.u32 %v478_v32, %v173_v16  ;;  %v174_v43 = vshrl.u32 %v473_v18, %v173_v16  ;;  %vm192_vm3 = vcmp.lt.s32.totalorder %v171_v17, 3  ;;  %vm191_vm4 = vcmp.lt.s32.totalorder %v171_v17, 2 }
  0xb0   : > { %v177_v35 = vor.u32 %v176_v22, %v175_v19  ;;  %v180_v36 = vor.u32 %v179_v24, %v178_v21  ;;  %v183_v37 = vor.u32 %v182_v27, %v181_v25  ;;  %v186_v38 = vor.u32 %v185_v30, %v184_v28 }
  0xb1   : > { %v189_v39 = vor.u32 %v188_v33, %v187_v31 }
  0xb2   : > { %v195_v40 = vsel %vm193_vm2, %v183_v37, 2102212464  ;;  %v198_v41 = vsel %vm190_vm1, %v177_v35, %v180_v36  ;;  %v202_v42 = vsel %vm190_vm1, %v180_v36, %v183_v37  ;;  %v199_v44 = vsel %vm193_vm2, %v186_v38, 920167782 }
  0xb3   : > { %v203_v45 = vsel %vm193_vm2, %v189_v39, 1326507024  ;;  %v200_v46 = vsel %vm192_vm3, %v183_v37, %v199_v44  ;;  %v194_v49 = vsel %vm190_vm1, %v174_v43, %v177_v35  ;;  %v196_v50 = vsel %vm192_vm3, %v180_v36, %v195_v40 }
  0xb4   : > { %v204_v47 = vsel %vm192_vm3, %v186_v38, %v203_v45  ;;  %v201_v51 = vsel %vm191_vm4, %v198_v41, %v200_v46  ;;  %v197_v57 = vsel %vm191_vm4, %v194_v49, %v196_v50 }
  0xb5   : > { %v205_v52 = vsel %vm191_vm4, %v202_v42, %v204_v47  ;;  %v563_v55 = vmul.u32.u64.low %v206_v48, %v201_v51  ;;  %v564_v56 = vmul.u32.u64.high %v206_v48, %v201_v51, %v563_v55  ;;  %v213_v59 = vmul.u32 %v206_v48, %v197_v57 }
  0xb6   : > { %v560_v53 = vmul.u32.u64.low %v206_v48, %v205_v52  ;;  %v561_v54 = vmul.u32.u64.high %v206_v48, %v205_v52, %v560_v53 }
  0xb7   : > { %v216_v58 = vadd.s32 1, %v564_v56 }
  0xb8   : > { %vm215_vm5 = vc.u32 %v561_v54, %v563_v55  ;;  %v214_v8 = vadd.s32 %v563_v55, %v561_v54 }
  0xb9   : > { %v217_v60 = vsel %vm215_vm5, %v216_v58, %v564_v56 }
  0xba   : > { %v218_v61 = vadd.s32 %v217_v60, %v213_v59 }
  0xbc   : > { %v219_v62 = vadd.s32 536870912, %v218_v61 }
  0xbe   : > { %v220_v63 = vshrl.u32 %v219_v62, 30 }
  0xc0   : > { %v221_v0 = vshll.u32 %v220_v63, 30  ;;  %v244_v21 = vsub.s32 4, %v220_v63 }
  0xc2   : > { %v222_v1 = vsub.s32 %v218_v61, %v221_v0  ;;  %v245_v24 = vsel %vm160_vm7, %v244_v21, %v220_v63 }
  0xc3   : > { %v247_v26 = vsel %vm159_vm8, 0, %v245_v24 }
  0xc4   : > { %v224_v2 = vsub.s32 0, %v222_v1  ;;  %v251_v27 = vadd.s32 3, %v247_v26 }
  0xc6   : > { %v346_v3 = vmin.u32 %v224_v2, %v222_v1  ;;  %v252_v28 = vand.u32 3, %v251_v27 }
  0xc8   : > { %v226_v4 = vclz %v346_v3  ;;  %vm257_vm9 = vcmp.eq.s32.totalorder %v252_v28, 2  ;;  %vm254_vm10 = vcmp.eq.s32.totalorder %v252_v28, 0  ;;  %vm253_vm11 = vcmp.lt.s32.totalorder %v252_v28, 2 }
  0xca   : > { %v347_v5 = vadd.s32 4294967294, %v226_v4 }
  0xcc   : > { %vm348_vm6 = vcmp.lt.s32.totalorder %v347_v5, 0 }
  0xcd   : > { %v229_v6 = vsel %vm348_vm6, 0, %v347_v5 }
  0xce   : > { %v230_v9 = vsub.s32 32, %v229_v6  ;;  %v234_v10 = vsub.s32 4294967266, %v229_v6  ;;  %v231_v11 = vshll.u32 %v222_v1, %v229_v6 }
  0xd0   : > { %v232_v13 = vshrl.u32 %v214_v8, %v230_v9  ;;  %v235_v14 = vadd.s32 127, %v234_v10 }
  0xd2   : > { %v233_v15 = vor.u32 %v232_v13, %v231_v11  ;;  %v236_v16 = vshll.u32 %v235_v14, 23 }
  0xd4   : > { %v237_v17 = vor.u32 4788187, %v236_v16  ;;  %v240_v19 = vcvt.s32.f32 %v233_v15 }
  0xd6   : > { %v238_v18 = vand.u32 2147483647, %v237_v17 }
  0xd8   : > { %v241_v20 = vmul.f32 %v240_v19, %v238_v18 }
  0xda   : > { %v242_v22 = vxor.u32 2147483648, %v241_v20 }
  0xdc   : > { %v243_v23 = vsel %vm160_vm7, %v242_v22, %v241_v20 }
  0xdd   : > { %v246_v25 = vsel %vm159_vm8, %v554_v7, %v243_v23 }
  0xde   : > { %404 = vcosq.f32 %v246_v25 }
  0xdf   : > { %406 = vsinq.f32 %v246_v25 }
  0xe8   : > { %v405_v29 = vpop.eup %404 }
  0xe9   : > { %v407_v30 = vpop.eup %406  ;;  %v258_v31 = vxor.u32 2147483648, %v405_v29 }
  0xea   : > { %v255_v32 = vxor.u32 2147483648, %v407_v30 }
  0xeb   : > { %v259_v12 = vsel %vm257_vm9, %v258_v31, %v407_v30 }
  0xec   : > { %v256_v33 = vsel %vm254_vm10, %v405_v29, %v255_v32 }
  0xed   : > { %v260_v34 = vsel %vm253_vm11, %v256_v33, %v259_v12 }
  0xee   : > { %v261_v35 = vsel %vm250_vm13, nan, %v260_v34 }
  0xef   : > { %263 = vst.msk [vmem:[%s134_s5] sm:$0xff] %vm262_vm12, %v261_v35 }
  0xf0   : > { %421 = shalt.err (!%p418_p3)
}
  0xf1   : > { %s422_s23 = scalar_lea.hbm %s580_s14, 128  ;;  %s426_s26 = scalar_lea.hbm %s624_s2, 256 }
  0xf2   : > { %p423_p4 = scmp.ne.s32.totalorder %s580_s14, %s422_s23  ;;  %p427_p9 = scmp.lt.u32.totalorder %s580_s14, %s624_s2 }
  0xf3   : > { %p428_p10 = scmp.lt.u32.totalorder %s426_s26, %s422_s23  ;;  %p430_p12 = scmp.lt.u32.totalorder %s422_s23, %s580_s14 }
  0xf4   : > { %p424_p7 = pnand %p423_p4, %p533_p5 }
  0xf5   : > { %p429_p11 = por %p428_p10, %p427_p9 }
  0xf6   : > { %p425_p8 = pneg %p424_p7 }
  0xf7   : > { %p431_p13 = por %p430_p12, %p429_p11 }
  0xf9   : > { %p432_p0 = pnand %p431_p13, %p425_p8 }
  0xfb   : > { %435 = shalt.err (!%p432_p0)
}
  0xfc   : > { %357 = dma.vmem_to_hbm [thread:$0]  (%p533_p5), %s582_s6, 128, %s580_s14, %s265_s13  }
  0xfd PF: > { %p363_p1 = scmp.ge.s32.totalorder %s470_s12, 2  ;;  %s290_s29 = sand.u32 1, %s458_s9  }
  0xfe   : > { %s291_s30 = scalar_lea.sflag [#allocation3], %s290_s29 }
  0xff   : > { %p360_p2 = pnand %p363_p1, %p537_p6 }
 0x101   : > { %453 = dma.done.wait (!%p360_p2), %s291_s30, 128  }
 0x102   : > { %455 = vsyncadd (!%p360_p2), %s291_s30, 4294967168  ;;  %p12_p3 = scmp.ge.s32.totalorder %s520_s15, 4   ;;  %s627_s9 = smov %s462_s10 }
 0x103   : > { %s628_s10 = smov %s466_s11  ;;  %s629_s11 = smov %s531_s18 }
 0x104   : > { %s630_s12 = smov %s520_s15  ;;  %14 = sbr.rel (!%p12_p3) target bundleno = 3 (0x3), region = 63 }
 0x10b   :  { %296 = vsyncpa [#allocation3], 1 }
 0x10c   :  { %298 = vsyncpa [#allocation3 + $0x1], 1 }

</bundles_post_ra>
